<compile_context>
chip_gen: v7x
topology: tpu7x:2x2x1
jax: 0.10.0
libtpu: 0.0.40
codegen_flags: <defaults>
</compile_context>

<pallas_src>
import functools

import jax
import jax.numpy as jnp
from jax.experimental import pallas as pl
from jax.experimental.pallas import tpu as pltpu


# ------------------------------ kernel helpers ------------------------------

def _act(x, if_relu):
    return jnp.maximum(x, 0.0) if if_relu else jnp.tanh(x)


# ------------------------------- fused kernel -------------------------------

def fused_dnn_kernel(*refs, if_relu, if_rtn, L, Lf, K, n_real):
    refs = list(refs)
    out_ref = refs.pop()                      # (B, M) logits
    it = iter(refs)
    h_ref = next(it)                          # SMEM (2L,) interleaved channel taps
    x_ref = next(it)                          # (B, M) one-hot messages
    noise_ref = next(it)                      # (B, 2K) interleaved AWGN
    ew1, eb1 = next(it)[...], next(it)[...]
    ew2r, ew2i = next(it)[...], next(it)[...]
    eb2r, eb2i = next(it)[...], next(it)[...]
    if if_rtn:
        rw1r, rw1i, rb1 = next(it)[...], next(it)[...], next(it)[...]
        rw2, rb2 = next(it)[...], next(it)[...]
        rw3r, rw3i = next(it)[...], next(it)[...]
        rb3r, rb3i = next(it)[...], next(it)[...]
    dw1r, dw1i, db1 = next(it)[...], next(it)[...], next(it)[...]
    dw2, db2 = next(it)[...], next(it)[...]

    f32 = jnp.float32
    x = x_ref[...]

    # ---------------- encoder: fc1 -> activ -> fc2 -> power norm -------------
    h1 = _act(jnp.dot(x, ew1, preferred_element_type=f32) + eb1, if_relu)
    z_re = jnp.dot(h1, ew2r, preferred_element_type=f32) + eb2r      # (B, K)
    z_im = jnp.dot(h1, ew2i, preferred_element_type=f32) + eb2i      # (B, K)
    # ||z||^2 over the 2K interleaved reals == sum(re^2) + sum(im^2)
    sumsq = jnp.sum(z_re * z_re + z_im * z_im, axis=1, keepdims=True)
    coef = ((n_real ** 0.5) * (0.5 ** 0.5)) * jax.lax.rsqrt(sumsq)   # EUP rsqrt
    tx_re = z_re * coef
    tx_im = z_im * coef

    # ------------- noise de-interleave in-kernel: (B, 2K) -> (B, K) ----------
    row2 = jax.lax.broadcasted_iota(jnp.int32, (n_real, K), 0)
    col2 = jax.lax.broadcasted_iota(jnp.int32, (n_real, K), 1)
    d_re = (row2 == 2 * col2).astype(f32)
    d_im = (row2 == 2 * col2 + 1).astype(f32)
    noise = noise_ref[...]
    n_re = jnp.dot(noise, d_re, preferred_element_type=f32)
    n_im = jnp.dot(noise, d_im, preferred_element_type=f32)

    # -------- channel: causal complex FIR as a Toeplitz matmul + AWGN --------
    row = jax.lax.broadcasted_iota(jnp.int32, (K, K), 0)
    col = jax.lax.broadcasted_iota(jnp.int32, (K, K), 1)
    diff = col - row                                   # output index - input index
    t_re = jnp.zeros((K, K), f32)
    t_im = jnp.zeros((K, K), f32)
    for l in range(L):                                 # static unroll, SMEM scalar taps
        t_re = jnp.where(diff == l, h_ref[2 * l], t_re)
        t_im = jnp.where(diff == l, h_ref[2 * l + 1], t_im)
    rx_re = (n_re + jnp.dot(tx_re, t_re, preferred_element_type=f32)
                  - jnp.dot(tx_im, t_im, preferred_element_type=f32))
    rx_im = (n_im + jnp.dot(tx_re, t_im, preferred_element_type=f32)
                  + jnp.dot(tx_im, t_re, preferred_element_type=f32))

    # ---------------- channel estimation + one-tap equalization --------------
    # TODO(synk): channel_estimate()/signal_est() are not defined in the provided
    # module; using a tap-0 matched-filter estimate + one-tap zero-forcing EQ.
    num_re = jnp.sum(rx_re * tx_re + rx_im * tx_im, axis=1, keepdims=True)
    num_im = jnp.sum(rx_im * tx_re - rx_re * tx_im, axis=1, keepdims=True)
    den = jnp.sum(tx_re * tx_re + tx_im * tx_im, axis=1, keepdims=True)
    inv_den = pl.reciprocal(den, approx=True)          # EUP
    h0_re = num_re * inv_den
    h0_im = num_im * inv_den
    inv_h0 = pl.reciprocal(h0_re * h0_re + h0_im * h0_im, approx=True)
    eq_re = (rx_re * h0_re + rx_im * h0_im) * inv_h0   # (B, K)
    eq_im = (rx_im * h0_re - rx_re * h0_im) * inv_h0   # (B, K)

    # ---------------- RTN: inverse-filter estimate + transposed conv ---------
    if if_rtn:
        r1 = jnp.tanh(jnp.dot(eq_re, rw1r, preferred_element_type=f32)
                      + jnp.dot(eq_im, rw1i, preferred_element_type=f32) + rb1)
        r2 = jnp.tanh(jnp.dot(r1, rw2, preferred_element_type=f32) + rb2)
        hinv_re = jnp.dot(r2, rw3r, preferred_element_type=f32) + rb3r   # (B, Lf)
        hinv_im = jnp.dot(r2, rw3i, preferred_element_type=f32) + rb3i
        # Per-sample complex transposed convolution, truncated to K symbols so
        # the decoder input stays n-dimensional.
        # TODO(synk): verify truncation matches the reference complex_conv_transpose.
        dec_re = jnp.zeros_like(eq_re)
        dec_im = jnp.zeros_like(eq_im)
        for f in range(min(Lf, K)):
            s_f = (diff == f).astype(f32)              # shift-right-by-f matrix
            sh_re = jnp.dot(eq_re, s_f, preferred_element_type=f32)
            sh_im = jnp.dot(eq_im, s_f, preferred_element_type=f32)
            hr = hinv_re[:, f:f + 1]                   # (B, 1) tap, lane-broadcasts
            hi = hinv_im[:, f:f + 1]
            dec_re = dec_re + hr * sh_re - hi * sh_im
            dec_im = dec_im + hr * sh_im + hi * sh_re
    else:
        dec_re, dec_im = eq_re, eq_im

    # ---------------- decoder -------------------------------------------------
    d1 = _act(jnp.dot(dec_re, dw1r, preferred_element_type=f32)
              + jnp.dot(dec_im, dw1i, preferred_element_type=f32) + db1, if_relu)
    out_ref[...] = jnp.dot(d1, dw2, preferred_element_type=f32) + db2


# ----------------------------- parameter prep --------------------------------

def prepare_params(params, if_RTN):
    """One-time even/odd (re/im) splits so the kernel is fully planar."""
    p = {
        "enc_w1": params["enc_w1"], "enc_b1": params["enc_b1"],
        "enc_w2_re": params["enc_w2"][:, 0::2], "enc_w2_im": params["enc_w2"][:, 1::2],
        "enc_b2_re": params["enc_b2"][:, 0::2], "enc_b2_im": params["enc_b2"][:, 1::2],
        "dec_w1_re": params["dec_w1"][0::2, :], "dec_w1_im": params["dec_w1"][1::2, :],
        "dec_b1": params["dec_b1"],
        "dec_w2": params["dec_w2"], "dec_b2": params["dec_b2"],
    }
    if if_RTN:
        p.update({
            "rtn_w1_re": params["rtn_w1"][0::2, :], "rtn_w1_im": params["rtn_w1"][1::2, :],
            "rtn_b1": params["rtn_b1"],
            "rtn_w2": params["rtn_w2"], "rtn_b2": params["rtn_b2"],
            "rtn_w3_re": params["rtn_w3"][:, 0::2], "rtn_w3_im": params["rtn_w3"][:, 1::2],
            "rtn_b3_re": params["rtn_b3"][:, 0::2], "rtn_b3_im": params["rtn_b3"][:, 1::2],
        })
    return p


# ------------------------------- forward pass ---------------------------------

@functools.partial(jax.jit, static_argnames=("if_relu", "if_RTN"))
def basic_dnn_forward(prepped, x, h, noise, *, if_relu, if_RTN):
    B = x.shape[0]
    K = prepped["enc_w2_re"].shape[1]            # complex channel uses
    n_real = 2 * K                               # interleaved real dim (n)
    L = h.shape[0] // 2                          # channel taps
    Lf = prepped["rtn_w3_re"].shape[1] if if_RTN else 0
    M_out = prepped["dec_w2"].shape[1]

    inputs = [h, x, noise,
              prepped["enc_w1"], prepped["enc_b1"],
              prepped["enc_w2_re"], prepped["enc_w2_im"],
              prepped["enc_b2_re"], prepped["enc_b2_im"]]
    if if_RTN:
        inputs += [prepped["rtn_w1_re"], prepped["rtn_w1_im"], prepped["rtn_b1"],
                   prepped["rtn_w2"], prepped["rtn_b2"],
                   prepped["rtn_w3_re"], prepped["rtn_w3_im"],
                   prepped["rtn_b3_re"], prepped["rtn_b3_im"]]
    inputs += [prepped["dec_w1_re"], prepped["dec_w1_im"], prepped["dec_b1"],
               prepped["dec_w2"], prepped["dec_b2"]]

    smem = pl.BlockSpec(memory_space=pltpu.MemorySpace.SMEM)
    vmem = pl.BlockSpec(memory_space=pltpu.MemorySpace.VMEM)
    in_specs = [smem] + [vmem] * (len(inputs) - 1)

    kernel = functools.partial(fused_dnn_kernel, if_relu=if_relu, if_rtn=if_RTN,
                               L=L, Lf=Lf, K=K, n_real=n_real)
    return pl.pallas_call(
        kernel,
        out_shape=jax.ShapeDtypeStruct((B, M_out), jnp.float32),
        in_specs=in_specs,
        out_specs=vmem,
    )(*inputs)


# -------------------------------- param init ----------------------------------

def init_linear(key, fan_in, fan_out, if_bias):
    # PyTorch nn.Linear default: U(-1/sqrt(fan_in), 1/sqrt(fan_in)); stored as
    # (in, out) so kernels compute x @ W + b.
    kw, kb = jax.random.split(key)
    bound = 1.0 / (fan_in ** 0.5)
    w = jax.random.uniform(kw, (fan_in, fan_out), jnp.float32, -bound, bound)
    if if_bias:
        b = jax.random.uniform(kb, (1, fan_out), jnp.float32, -bound, bound)
    else:
        b = jnp.zeros((1, fan_out), jnp.float32)
    return w, b


if __name__ == "__main__":
    # Module hyper-parameters
    M = 16                    # message cardinality (one-hot input / logits output)
    num_neurons_encoder = 32
    n = 8                     # channel uses (interleaved -> K=4 complex symbols)
    n_inv_filter = 3          # RTN inverse-filter taps (complex)
    num_neurons_decoder = 32
    if_bias, if_relu, if_RTN = True, True, True

    B = 8                     # batch
    L_ch = 3                  # channel taps (complex)

    key = jax.random.PRNGKey(0)
    ks = jax.random.split(key, 11)

    params = {}
    params["enc_w1"], params["enc_b1"] = init_linear(ks[0], M, num_neurons_encoder, if_bias)
    params["enc_w2"], params["enc_b2"] = init_linear(ks[1], num_neurons_encoder, n, if_bias)
    params["rtn_w1"], params["rtn_b1"] = init_linear(ks[2], n, n, if_bias)
    params["rtn_w2"], params["rtn_b2"] = init_linear(ks[3], n, n, if_bias)
    params["rtn_w3"], params["rtn_b3"] = init_linear(ks[4], n, 2 * n_inv_filter, if_bias)
    params["dec_w1"], params["dec_b1"] = init_linear(ks[5], n, num_neurons_decoder, if_bias)
    params["dec_w2"], params["dec_b2"] = init_linear(ks[6], num_neurons_decoder, M, if_bias)

    prepped = prepare_params(params, if_RTN)

    # One-hot message inputs, Rayleigh-ish channel taps, Gaussian noise sample.
    labels = jax.random.randint(ks[7], (B,), 0, M)
    x = jax.nn.one_hot(labels, M, dtype=jnp.float32)
    h = (0.5 ** 0.5) * jax.random.normal(ks[8], (2 * L_ch,), jnp.float32)
    noise = 0.1 * jax.random.normal(ks[9], (B, n), jnp.float32)

    out = basic_dnn_forward(prepped, x, h, noise, if_relu=if_relu, if_RTN=if_RTN)
    out = jax.block_until_ready(out)
    assert out.shape == (B, M) and out.dtype == jnp.float32
    assert bool(jnp.all(jnp.isfinite(out)))
    print("KERNEL_OK")
</pallas_src>

<mosaic_0001>
module attributes {stable_mosaic.version = 11 : i64} {
  func.func @fused_dnn_kernel(%arg0: memref<6xf32, #tpu.memory_space<smem>>, %arg1: memref<8x16xf32, #tpu.memory_space<vmem>>, %arg2: memref<8x8xf32, #tpu.memory_space<vmem>>, %arg3: memref<16x32xf32, #tpu.memory_space<vmem>>, %arg4: memref<1x32xf32, #tpu.memory_space<vmem>>, %arg5: memref<32x4xf32, #tpu.memory_space<vmem>>, %arg6: memref<32x4xf32, #tpu.memory_space<vmem>>, %arg7: memref<1x4xf32, #tpu.memory_space<vmem>>, %arg8: memref<1x4xf32, #tpu.memory_space<vmem>>, %arg9: memref<4x8xf32, #tpu.memory_space<vmem>>, %arg10: memref<4x8xf32, #tpu.memory_space<vmem>>, %arg11: memref<1x8xf32, #tpu.memory_space<vmem>>, %arg12: memref<8x8xf32, #tpu.memory_space<vmem>>, %arg13: memref<1x8xf32, #tpu.memory_space<vmem>>, %arg14: memref<8x3xf32, #tpu.memory_space<vmem>>, %arg15: memref<8x3xf32, #tpu.memory_space<vmem>>, %arg16: memref<1x3xf32, #tpu.memory_space<vmem>>, %arg17: memref<1x3xf32, #tpu.memory_space<vmem>>, %arg18: memref<4x32xf32, #tpu.memory_space<vmem>>, %arg19: memref<4x32xf32, #tpu.memory_space<vmem>>, %arg20: memref<1x32xf32, #tpu.memory_space<vmem>>, %arg21: memref<32x16xf32, #tpu.memory_space<vmem>>, %arg22: memref<1x16xf32, #tpu.memory_space<vmem>>, %arg23: memref<8x16xf32, #tpu.memory_space<vmem>>) attributes {dimension_semantics = [], scalar_prefetch = 0 : i64, scratch_operands = 0 : i64, tpu.core_type = #tpu.core_type<tc>} {
    %c0 = arith.constant 0 : index
    %c0_0 = arith.constant 0 : index
    %0 = vector.load %arg3[%c0, %c0_0] : memref<16x32xf32, #tpu.memory_space<vmem>>, vector<16x32xf32>
    %c0_1 = arith.constant 0 : index
    %c0_2 = arith.constant 0 : index
    %1 = vector.load %arg4[%c0_1, %c0_2] : memref<1x32xf32, #tpu.memory_space<vmem>>, vector<1x32xf32>
    %c0_3 = arith.constant 0 : index
    %c0_4 = arith.constant 0 : index
    %2 = vector.load %arg5[%c0_3, %c0_4] : memref<32x4xf32, #tpu.memory_space<vmem>>, vector<32x4xf32>
    %c0_5 = arith.constant 0 : index
    %c0_6 = arith.constant 0 : index
    %3 = vector.load %arg6[%c0_5, %c0_6] : memref<32x4xf32, #tpu.memory_space<vmem>>, vector<32x4xf32>
    %c0_7 = arith.constant 0 : index
    %c0_8 = arith.constant 0 : index
    %4 = vector.load %arg7[%c0_7, %c0_8] : memref<1x4xf32, #tpu.memory_space<vmem>>, vector<1x4xf32>
    %c0_9 = arith.constant 0 : index
    %c0_10 = arith.constant 0 : index
    %5 = vector.load %arg8[%c0_9, %c0_10] : memref<1x4xf32, #tpu.memory_space<vmem>>, vector<1x4xf32>
    %c0_11 = arith.constant 0 : index
    %c0_12 = arith.constant 0 : index
    %6 = vector.load %arg9[%c0_11, %c0_12] : memref<4x8xf32, #tpu.memory_space<vmem>>, vector<4x8xf32>
    %c0_13 = arith.constant 0 : index
    %c0_14 = arith.constant 0 : index
    %7 = vector.load %arg10[%c0_13, %c0_14] : memref<4x8xf32, #tpu.memory_space<vmem>>, vector<4x8xf32>
    %c0_15 = arith.constant 0 : index
    %c0_16 = arith.constant 0 : index
    %8 = vector.load %arg11[%c0_15, %c0_16] : memref<1x8xf32, #tpu.memory_space<vmem>>, vector<1x8xf32>
    %c0_17 = arith.constant 0 : index
    %c0_18 = arith.constant 0 : index
    %9 = vector.load %arg12[%c0_17, %c0_18] : memref<8x8xf32, #tpu.memory_space<vmem>>, vector<8x8xf32>
    %c0_19 = arith.constant 0 : index
    %c0_20 = arith.constant 0 : index
    %10 = vector.load %arg13[%c0_19, %c0_20] : memref<1x8xf32, #tpu.memory_space<vmem>>, vector<1x8xf32>
    %c0_21 = arith.constant 0 : index
    %c0_22 = arith.constant 0 : index
    %11 = vector.load %arg14[%c0_21, %c0_22] : memref<8x3xf32, #tpu.memory_space<vmem>>, vector<8x3xf32>
    %c0_23 = arith.constant 0 : index
    %c0_24 = arith.constant 0 : index
    %12 = vector.load %arg15[%c0_23, %c0_24] : memref<8x3xf32, #tpu.memory_space<vmem>>, vector<8x3xf32>
    %c0_25 = arith.constant 0 : index
    %c0_26 = arith.constant 0 : index
    %13 = vector.load %arg16[%c0_25, %c0_26] : memref<1x3xf32, #tpu.memory_space<vmem>>, vector<1x3xf32>
    %c0_27 = arith.constant 0 : index
    %c0_28 = arith.constant 0 : index
    %14 = vector.load %arg17[%c0_27, %c0_28] : memref<1x3xf32, #tpu.memory_space<vmem>>, vector<1x3xf32>
    %c0_29 = arith.constant 0 : index
    %c0_30 = arith.constant 0 : index
    %15 = vector.load %arg18[%c0_29, %c0_30] : memref<4x32xf32, #tpu.memory_space<vmem>>, vector<4x32xf32>
    %c0_31 = arith.constant 0 : index
    %c0_32 = arith.constant 0 : index
    %16 = vector.load %arg19[%c0_31, %c0_32] : memref<4x32xf32, #tpu.memory_space<vmem>>, vector<4x32xf32>
    %c0_33 = arith.constant 0 : index
    %c0_34 = arith.constant 0 : index
    %17 = vector.load %arg20[%c0_33, %c0_34] : memref<1x32xf32, #tpu.memory_space<vmem>>, vector<1x32xf32>
    %c0_35 = arith.constant 0 : index
    %c0_36 = arith.constant 0 : index
    %18 = vector.load %arg21[%c0_35, %c0_36] : memref<32x16xf32, #tpu.memory_space<vmem>>, vector<32x16xf32>
    %c0_37 = arith.constant 0 : index
    %c0_38 = arith.constant 0 : index
    %19 = vector.load %arg22[%c0_37, %c0_38] : memref<1x16xf32, #tpu.memory_space<vmem>>, vector<1x16xf32>
    %c0_39 = arith.constant 0 : index
    %c0_40 = arith.constant 0 : index
    %20 = vector.load %arg1[%c0_39, %c0_40] : memref<8x16xf32, #tpu.memory_space<vmem>>, vector<8x16xf32>
    %cst = arith.constant dense<0.000000e+00> : vector<8x32xf32>
    %21 = tpu.matmul %20, %0, %cst {dimension_numbers = #tpu.dot_dimension_numbers<[1], [0], [0], [1], [0, 0, 1, 1], [], []>} : vector<8x16xf32>, vector<16x32xf32>, vector<8x32xf32> -> vector<8x32xf32>
    %22 = vector.broadcast %1 : vector<1x32xf32> to vector<8x32xf32>
    %23 = arith.addf %21, %22 : vector<8x32xf32>
    %cst_41 = arith.constant 0.000000e+00 : f32
    %24 = vector.broadcast %cst_41 : f32 to vector<8x32xf32>
    %25 = arith.maximumf %23, %24 : vector<8x32xf32>
    %cst_42 = arith.constant dense<0.000000e+00> : vector<8x4xf32>
    %26 = tpu.matmul %25, %2, %cst_42 {dimension_numbers = #tpu.dot_dimension_numbers<[1], [0], [0], [1], [0, 0, 1, 1], [], []>} : vector<8x32xf32>, vector<32x4xf32>, vector<8x4xf32> -> vector<8x4xf32>
    %27 = vector.broadcast %4 : vector<1x4xf32> to vector<8x4xf32>
    %28 = arith.addf %26, %27 : vector<8x4xf32>
    %cst_43 = arith.constant dense<0.000000e+00> : vector<8x4xf32>
    %29 = tpu.matmul %25, %3, %cst_43 {dimension_numbers = #tpu.dot_dimension_numbers<[1], [0], [0], [1], [0, 0, 1, 1], [], []>} : vector<8x32xf32>, vector<32x4xf32>, vector<8x4xf32> -> vector<8x4xf32>
    %30 = vector.broadcast %5 : vector<1x4xf32> to vector<8x4xf32>
    %31 = arith.addf %29, %30 : vector<8x4xf32>
    %32 = arith.mulf %28, %28 : vector<8x4xf32>
    %33 = arith.mulf %31, %31 : vector<8x4xf32>
    %34 = arith.addf %32, %33 : vector<8x4xf32>
    %cst_44 = arith.constant dense<0.000000e+00> : vector<8xf32>
    %35 = vector.multi_reduction <add>, %34, %cst_44 [1] : vector<8x4xf32> to vector<8xf32>
    %36 = vector.shape_cast %35 : vector<8xf32> to vector<8x1xf32>
    %37 = math.rsqrt %36 : vector<8x1xf32>
    %cst_45 = arith.constant 2.000000e+00 : f32
    %38 = vector.broadcast %cst_45 : f32 to vector<8x1xf32>
    %39 = arith.mulf %38, %37 : vector<8x1xf32>
    %40 = vector.broadcast %39 : vector<8x1xf32> to vector<8x4xf32>
    %41 = arith.mulf %28, %40 : vector<8x4xf32>
    %42 = vector.broadcast %39 : vector<8x1xf32> to vector<8x4xf32>
    %43 = arith.mulf %31, %42 : vector<8x4xf32>
    %44 = tpu.iota {dimensions = array<i32: 0>} : vector<8x4xi32>
    %45 = tpu.iota {dimensions = array<i32: 1>} : vector<8x4xi32>
    %c2_i32 = arith.constant 2 : i32
    %46 = vector.broadcast %c2_i32 : i32 to vector<8x4xi32>
    %47 = arith.muli %46, %45 : vector<8x4xi32>
    %48 = arith.cmpi eq, %44, %47 : vector<8x4xi32>
    %49 = arith.extui %48 : vector<8x4xi1> to vector<8x4xi32>
    %50 = arith.sitofp %49 : vector<8x4xi32> to vector<8x4xf32>
    %c2_i32_46 = arith.constant 2 : i32
    %51 = vector.broadcast %c2_i32_46 : i32 to vector<8x4xi32>
    %52 = arith.muli %51, %45 : vector<8x4xi32>
    %c1_i32 = arith.constant 1 : i32
    %53 = vector.broadcast %c1_i32 : i32 to vector<8x4xi32>
    %54 = arith.addi %52, %53 : vector<8x4xi32>
    %55 = arith.cmpi eq, %44, %54 : vector<8x4xi32>
    %56 = arith.extui %55 : vector<8x4xi1> to vector<8x4xi32>
    %57 = arith.sitofp %56 : vector<8x4xi32> to vector<8x4xf32>
    %c0_47 = arith.constant 0 : index
    %c0_48 = arith.constant 0 : index
    %58 = vector.load %arg2[%c0_47, %c0_48] : memref<8x8xf32, #tpu.memory_space<vmem>>, vector<8x8xf32>
    %cst_49 = arith.constant dense<0.000000e+00> : vector<8x4xf32>
    %59 = tpu.matmul %58, %50, %cst_49 {dimension_numbers = #tpu.dot_dimension_numbers<[1], [0], [0], [1], [0, 0, 1, 1], [], []>} : vector<8x8xf32>, vector<8x4xf32>, vector<8x4xf32> -> vector<8x4xf32>
    %cst_50 = arith.constant dense<0.000000e+00> : vector<8x4xf32>
    %60 = tpu.matmul %58, %57, %cst_50 {dimension_numbers = #tpu.dot_dimension_numbers<[1], [0], [0], [1], [0, 0, 1, 1], [], []>} : vector<8x8xf32>, vector<8x4xf32>, vector<8x4xf32> -> vector<8x4xf32>
    %61 = tpu.iota {dimensions = array<i32: 0>} : vector<4x4xi32>
    %62 = tpu.iota {dimensions = array<i32: 1>} : vector<4x4xi32>
    %63 = arith.subi %62, %61 : vector<4x4xi32>
    %cst_51 = arith.constant 0.000000e+00 : f32
    %64 = vector.broadcast %cst_51 : f32 to vector<4x4xf32>
    %cst_52 = arith.constant 0.000000e+00 : f32
    %65 = vector.broadcast %cst_52 : f32 to vector<4x4xf32>
    %c0_i32 = arith.constant 0 : i32
    %66 = vector.broadcast %c0_i32 : i32 to vector<4x4xi32>
    %67 = arith.cmpi eq, %63, %66 : vector<4x4xi32>
    %c0_53 = arith.constant 0 : index
    %68 = memref.load %arg0[%c0_53] : memref<6xf32, #tpu.memory_space<smem>>
    %69 = vector.broadcast %68 : f32 to vector<4x4xf32>
    %70 = arith.select %67, %69, %64 : vector<4x4xi1>, vector<4x4xf32>
    %c0_i32_54 = arith.constant 0 : i32
    %71 = vector.broadcast %c0_i32_54 : i32 to vector<4x4xi32>
    %72 = arith.cmpi eq, %63, %71 : vector<4x4xi32>
    %c1 = arith.constant 1 : index
    %73 = memref.load %arg0[%c1] : memref<6xf32, #tpu.memory_space<smem>>
    %74 = vector.broadcast %73 : f32 to vector<4x4xf32>
    %75 = arith.select %72, %74, %65 : vector<4x4xi1>, vector<4x4xf32>
    %c1_i32_55 = arith.constant 1 : i32
    %76 = vector.broadcast %c1_i32_55 : i32 to vector<4x4xi32>
    %77 = arith.cmpi eq, %63, %76 : vector<4x4xi32>
    %c2 = arith.constant 2 : index
    %78 = memref.load %arg0[%c2] : memref<6xf32, #tpu.memory_space<smem>>
    %79 = vector.broadcast %78 : f32 to vector<4x4xf32>
    %80 = arith.select %77, %79, %70 : vector<4x4xi1>, vector<4x4xf32>
    %c1_i32_56 = arith.constant 1 : i32
    %81 = vector.broadcast %c1_i32_56 : i32 to vector<4x4xi32>
    %82 = arith.cmpi eq, %63, %81 : vector<4x4xi32>
    %c3 = arith.constant 3 : index
    %83 = memref.load %arg0[%c3] : memref<6xf32, #tpu.memory_space<smem>>
    %84 = vector.broadcast %83 : f32 to vector<4x4xf32>
    %85 = arith.select %82, %84, %75 : vector<4x4xi1>, vector<4x4xf32>
    %c2_i32_57 = arith.constant 2 : i32
    %86 = vector.broadcast %c2_i32_57 : i32 to vector<4x4xi32>
    %87 = arith.cmpi eq, %63, %86 : vector<4x4xi32>
    %c4 = arith.constant 4 : index
    %88 = memref.load %arg0[%c4] : memref<6xf32, #tpu.memory_space<smem>>
    %89 = vector.broadcast %88 : f32 to vector<4x4xf32>
    %90 = arith.select %87, %89, %80 : vector<4x4xi1>, vector<4x4xf32>
    %c2_i32_58 = arith.constant 2 : i32
    %91 = vector.broadcast %c2_i32_58 : i32 to vector<4x4xi32>
    %92 = arith.cmpi eq, %63, %91 : vector<4x4xi32>
    %c5 = arith.constant 5 : index
    %93 = memref.load %arg0[%c5] : memref<6xf32, #tpu.memory_space<smem>>
    %94 = vector.broadcast %93 : f32 to vector<4x4xf32>
    %95 = arith.select %92, %94, %85 : vector<4x4xi1>, vector<4x4xf32>
    %cst_59 = arith.constant dense<0.000000e+00> : vector<8x4xf32>
    %96 = tpu.matmul %41, %90, %cst_59 {dimension_numbers = #tpu.dot_dimension_numbers<[1], [0], [0], [1], [0, 0, 1, 1], [], []>} : vector<8x4xf32>, vector<4x4xf32>, vector<8x4xf32> -> vector<8x4xf32>
    %97 = arith.addf %59, %96 : vector<8x4xf32>
    %cst_60 = arith.constant dense<0.000000e+00> : vector<8x4xf32>
    %98 = tpu.matmul %43, %95, %cst_60 {dimension_numbers = #tpu.dot_dimension_numbers<[1], [0], [0], [1], [0, 0, 1, 1], [], []>} : vector<8x4xf32>, vector<4x4xf32>, vector<8x4xf32> -> vector<8x4xf32>
    %99 = arith.subf %97, %98 : vector<8x4xf32>
    %cst_61 = arith.constant dense<0.000000e+00> : vector<8x4xf32>
    %100 = tpu.matmul %41, %95, %cst_61 {dimension_numbers = #tpu.dot_dimension_numbers<[1], [0], [0], [1], [0, 0, 1, 1], [], []>} : vector<8x4xf32>, vector<4x4xf32>, vector<8x4xf32> -> vector<8x4xf32>
    %101 = arith.addf %60, %100 : vector<8x4xf32>
    %cst_62 = arith.constant dense<0.000000e+00> : vector<8x4xf32>
    %102 = tpu.matmul %43, %90, %cst_62 {dimension_numbers = #tpu.dot_dimension_numbers<[1], [0], [0], [1], [0, 0, 1, 1], [], []>} : vector<8x4xf32>, vector<4x4xf32>, vector<8x4xf32> -> vector<8x4xf32>
    %103 = arith.addf %101, %102 : vector<8x4xf32>
    %104 = arith.mulf %99, %41 : vector<8x4xf32>
    %105 = arith.mulf %103, %43 : vector<8x4xf32>
    %106 = arith.addf %104, %105 : vector<8x4xf32>
    %cst_63 = arith.constant dense<0.000000e+00> : vector<8xf32>
    %107 = vector.multi_reduction <add>, %106, %cst_63 [1] : vector<8x4xf32> to vector<8xf32>
    %108 = vector.shape_cast %107 : vector<8xf32> to vector<8x1xf32>
    %109 = arith.mulf %103, %41 : vector<8x4xf32>
    %110 = arith.mulf %99, %43 : vector<8x4xf32>
    %111 = arith.subf %109, %110 : vector<8x4xf32>
    %cst_64 = arith.constant dense<0.000000e+00> : vector<8xf32>
    %112 = vector.multi_reduction <add>, %111, %cst_64 [1] : vector<8x4xf32> to vector<8xf32>
    %113 = vector.shape_cast %112 : vector<8xf32> to vector<8x1xf32>
    %114 = arith.mulf %41, %41 : vector<8x4xf32>
    %115 = arith.mulf %43, %43 : vector<8x4xf32>
    %116 = arith.addf %114, %115 : vector<8x4xf32>
    %cst_65 = arith.constant dense<0.000000e+00> : vector<8xf32>
    %117 = vector.multi_reduction <add>, %116, %cst_65 [1] : vector<8x4xf32> to vector<8xf32>
    %118 = vector.shape_cast %117 : vector<8xf32> to vector<8x1xf32>
    %119 = tpu.reciprocal %118 {approx = true} : vector<8x1xf32> -> vector<8x1xf32>
    %120 = arith.mulf %108, %119 : vector<8x1xf32>
    %121 = arith.mulf %113, %119 : vector<8x1xf32>
    %122 = arith.mulf %120, %120 : vector<8x1xf32>
    %123 = arith.mulf %121, %121 : vector<8x1xf32>
    %124 = arith.addf %122, %123 : vector<8x1xf32>
    %125 = tpu.reciprocal %124 {approx = true} : vector<8x1xf32> -> vector<8x1xf32>
    %126 = vector.broadcast %120 : vector<8x1xf32> to vector<8x4xf32>
    %127 = arith.mulf %99, %126 : vector<8x4xf32>
    %128 = vector.broadcast %121 : vector<8x1xf32> to vector<8x4xf32>
    %129 = arith.mulf %103, %128 : vector<8x4xf32>
    %130 = arith.addf %127, %129 : vector<8x4xf32>
    %131 = vector.broadcast %125 : vector<8x1xf32> to vector<8x4xf32>
    %132 = arith.mulf %130, %131 : vector<8x4xf32>
    %133 = vector.broadcast %120 : vector<8x1xf32> to vector<8x4xf32>
    %134 = arith.mulf %103, %133 : vector<8x4xf32>
    %135 = vector.broadcast %121 : vector<8x1xf32> to vector<8x4xf32>
    %136 = arith.mulf %99, %135 : vector<8x4xf32>
    %137 = arith.subf %134, %136 : vector<8x4xf32>
    %138 = vector.broadcast %125 : vector<8x1xf32> to vector<8x4xf32>
    %139 = arith.mulf %137, %138 : vector<8x4xf32>
    %cst_66 = arith.constant dense<0.000000e+00> : vector<8x8xf32>
    %140 = tpu.matmul %132, %6, %cst_66 {dimension_numbers = #tpu.dot_dimension_numbers<[1], [0], [0], [1], [0, 0, 1, 1], [], []>} : vector<8x4xf32>, vector<4x8xf32>, vector<8x8xf32> -> vector<8x8xf32>
    %cst_67 = arith.constant dense<0.000000e+00> : vector<8x8xf32>
    %141 = tpu.matmul %139, %7, %cst_67 {dimension_numbers = #tpu.dot_dimension_numbers<[1], [0], [0], [1], [0, 0, 1, 1], [], []>} : vector<8x4xf32>, vector<4x8xf32>, vector<8x8xf32> -> vector<8x8xf32>
    %142 = arith.addf %140, %141 : vector<8x8xf32>
    %143 = vector.broadcast %8 : vector<1x8xf32> to vector<8x8xf32>
    %144 = arith.addf %142, %143 : vector<8x8xf32>
    %145 = math.tanh %144 : vector<8x8xf32>
    %cst_68 = arith.constant dense<0.000000e+00> : vector<8x8xf32>
    %146 = tpu.matmul %145, %9, %cst_68 {dimension_numbers = #tpu.dot_dimension_numbers<[1], [0], [0], [1], [0, 0, 1, 1], [], []>} : vector<8x8xf32>, vector<8x8xf32>, vector<8x8xf32> -> vector<8x8xf32>
    %147 = vector.broadcast %10 : vector<1x8xf32> to vector<8x8xf32>
    %148 = arith.addf %146, %147 : vector<8x8xf32>
    %149 = math.tanh %148 : vector<8x8xf32>
    %cst_69 = arith.constant dense<0.000000e+00> : vector<8x3xf32>
    %150 = tpu.matmul %149, %11, %cst_69 {dimension_numbers = #tpu.dot_dimension_numbers<[1], [0], [0], [1], [0, 0, 1, 1], [], []>} : vector<8x8xf32>, vector<8x3xf32>, vector<8x3xf32> -> vector<8x3xf32>
    %151 = vector.broadcast %13 : vector<1x3xf32> to vector<8x3xf32>
    %152 = arith.addf %150, %151 : vector<8x3xf32>
    %cst_70 = arith.constant dense<0.000000e+00> : vector<8x3xf32>
    %153 = tpu.matmul %149, %12, %cst_70 {dimension_numbers = #tpu.dot_dimension_numbers<[1], [0], [0], [1], [0, 0, 1, 1], [], []>} : vector<8x8xf32>, vector<8x3xf32>, vector<8x3xf32> -> vector<8x3xf32>
    %154 = vector.broadcast %14 : vector<1x3xf32> to vector<8x3xf32>
    %155 = arith.addf %153, %154 : vector<8x3xf32>
    %cst_71 = arith.constant 0.000000e+00 : f32
    %156 = vector.broadcast %cst_71 : f32 to vector<8x4xf32>
    %cst_72 = arith.constant 0.000000e+00 : f32
    %157 = vector.broadcast %cst_72 : f32 to vector<8x4xf32>
    %c0_i32_73 = arith.constant 0 : i32
    %158 = vector.broadcast %c0_i32_73 : i32 to vector<4x4xi32>
    %159 = arith.cmpi eq, %63, %158 : vector<4x4xi32>
    %160 = arith.extui %159 : vector<4x4xi1> to vector<4x4xi32>
    %161 = arith.sitofp %160 : vector<4x4xi32> to vector<4x4xf32>
    %cst_74 = arith.constant dense<0.000000e+00> : vector<8x4xf32>
    %162 = tpu.matmul %132, %161, %cst_74 {dimension_numbers = #tpu.dot_dimension_numbers<[1], [0], [0], [1], [0, 0, 1, 1], [], []>} : vector<8x4xf32>, vector<4x4xf32>, vector<8x4xf32> -> vector<8x4xf32>
    %cst_75 = arith.constant dense<0.000000e+00> : vector<8x4xf32>
    %163 = tpu.matmul %139, %161, %cst_75 {dimension_numbers = #tpu.dot_dimension_numbers<[1], [0], [0], [1], [0, 0, 1, 1], [], []>} : vector<8x4xf32>, vector<4x4xf32>, vector<8x4xf32> -> vector<8x4xf32>
    %164 = vector.extract_strided_slice %152 {offsets = [0, 0], sizes = [8, 1], strides = [1, 1]} : vector<8x3xf32> to vector<8x1xf32>
    %165 = vector.extract_strided_slice %155 {offsets = [0, 0], sizes = [8, 1], strides = [1, 1]} : vector<8x3xf32> to vector<8x1xf32>
    %166 = vector.broadcast %164 : vector<8x1xf32> to vector<8x4xf32>
    %167 = arith.mulf %166, %162 : vector<8x4xf32>
    %168 = arith.addf %156, %167 : vector<8x4xf32>
    %169 = vector.broadcast %165 : vector<8x1xf32> to vector<8x4xf32>
    %170 = arith.mulf %169, %163 : vector<8x4xf32>
    %171 = arith.subf %168, %170 : vector<8x4xf32>
    %172 = vector.broadcast %164 : vector<8x1xf32> to vector<8x4xf32>
    %173 = arith.mulf %172, %163 : vector<8x4xf32>
    %174 = arith.addf %157, %173 : vector<8x4xf32>
    %175 = vector.broadcast %165 : vector<8x1xf32> to vector<8x4xf32>
    %176 = arith.mulf %175, %162 : vector<8x4xf32>
    %177 = arith.addf %174, %176 : vector<8x4xf32>
    %c1_i32_76 = arith.constant 1 : i32
    %178 = vector.broadcast %c1_i32_76 : i32 to vector<4x4xi32>
    %179 = arith.cmpi eq, %63, %178 : vector<4x4xi32>
    %180 = arith.extui %179 : vector<4x4xi1> to vector<4x4xi32>
    %181 = arith.sitofp %180 : vector<4x4xi32> to vector<4x4xf32>
    %cst_77 = arith.constant dense<0.000000e+00> : vector<8x4xf32>
    %182 = tpu.matmul %132, %181, %cst_77 {dimension_numbers = #tpu.dot_dimension_numbers<[1], [0], [0], [1], [0, 0, 1, 1], [], []>} : vector<8x4xf32>, vector<4x4xf32>, vector<8x4xf32> -> vector<8x4xf32>
    %cst_78 = arith.constant dense<0.000000e+00> : vector<8x4xf32>
    %183 = tpu.matmul %139, %181, %cst_78 {dimension_numbers = #tpu.dot_dimension_numbers<[1], [0], [0], [1], [0, 0, 1, 1], [], []>} : vector<8x4xf32>, vector<4x4xf32>, vector<8x4xf32> -> vector<8x4xf32>
    %184 = vector.extract_strided_slice %152 {offsets = [0, 1], sizes = [8, 1], strides = [1, 1]} : vector<8x3xf32> to vector<8x1xf32>
    %185 = vector.extract_strided_slice %155 {offsets = [0, 1], sizes = [8, 1], strides = [1, 1]} : vector<8x3xf32> to vector<8x1xf32>
    %186 = vector.broadcast %184 : vector<8x1xf32> to vector<8x4xf32>
    %187 = arith.mulf %186, %182 : vector<8x4xf32>
    %188 = arith.addf %171, %187 : vector<8x4xf32>
    %189 = vector.broadcast %185 : vector<8x1xf32> to vector<8x4xf32>
    %190 = arith.mulf %189, %183 : vector<8x4xf32>
    %191 = arith.subf %188, %190 : vector<8x4xf32>
    %192 = vector.broadcast %184 : vector<8x1xf32> to vector<8x4xf32>
    %193 = arith.mulf %192, %183 : vector<8x4xf32>
    %194 = arith.addf %177, %193 : vector<8x4xf32>
    %195 = vector.broadcast %185 : vector<8x1xf32> to vector<8x4xf32>
    %196 = arith.mulf %195, %182 : vector<8x4xf32>
    %197 = arith.addf %194, %196 : vector<8x4xf32>
    %c2_i32_79 = arith.constant 2 : i32
    %198 = vector.broadcast %c2_i32_79 : i32 to vector<4x4xi32>
    %199 = arith.cmpi eq, %63, %198 : vector<4x4xi32>
    %200 = arith.extui %199 : vector<4x4xi1> to vector<4x4xi32>
    %201 = arith.sitofp %200 : vector<4x4xi32> to vector<4x4xf32>
    %cst_80 = arith.constant dense<0.000000e+00> : vector<8x4xf32>
    %202 = tpu.matmul %132, %201, %cst_80 {dimension_numbers = #tpu.dot_dimension_numbers<[1], [0], [0], [1], [0, 0, 1, 1], [], []>} : vector<8x4xf32>, vector<4x4xf32>, vector<8x4xf32> -> vector<8x4xf32>
    %cst_81 = arith.constant dense<0.000000e+00> : vector<8x4xf32>
    %203 = tpu.matmul %139, %201, %cst_81 {dimension_numbers = #tpu.dot_dimension_numbers<[1], [0], [0], [1], [0, 0, 1, 1], [], []>} : vector<8x4xf32>, vector<4x4xf32>, vector<8x4xf32> -> vector<8x4xf32>
    %204 = vector.extract_strided_slice %152 {offsets = [0, 2], sizes = [8, 1], strides = [1, 1]} : vector<8x3xf32> to vector<8x1xf32>
    %205 = vector.extract_strided_slice %155 {offsets = [0, 2], sizes = [8, 1], strides = [1, 1]} : vector<8x3xf32> to vector<8x1xf32>
    %206 = vector.broadcast %204 : vector<8x1xf32> to vector<8x4xf32>
    %207 = arith.mulf %206, %202 : vector<8x4xf32>
    %208 = arith.addf %191, %207 : vector<8x4xf32>
    %209 = vector.broadcast %205 : vector<8x1xf32> to vector<8x4xf32>
    %210 = arith.mulf %209, %203 : vector<8x4xf32>
    %211 = arith.subf %208, %210 : vector<8x4xf32>
    %212 = vector.broadcast %204 : vector<8x1xf32> to vector<8x4xf32>
    %213 = arith.mulf %212, %203 : vector<8x4xf32>
    %214 = arith.addf %197, %213 : vector<8x4xf32>
    %215 = vector.broadcast %205 : vector<8x1xf32> to vector<8x4xf32>
    %216 = arith.mulf %215, %202 : vector<8x4xf32>
    %217 = arith.addf %214, %216 : vector<8x4xf32>
    %cst_82 = arith.constant dense<0.000000e+00> : vector<8x32xf32>
    %218 = tpu.matmul %211, %15, %cst_82 {dimension_numbers = #tpu.dot_dimension_numbers<[1], [0], [0], [1], [0, 0, 1, 1], [], []>} : vector<8x4xf32>, vector<4x32xf32>, vector<8x32xf32> -> vector<8x32xf32>
    %cst_83 = arith.constant dense<0.000000e+00> : vector<8x32xf32>
    %219 = tpu.matmul %217, %16, %cst_83 {dimension_numbers = #tpu.dot_dimension_numbers<[1], [0], [0], [1], [0, 0, 1, 1], [], []>} : vector<8x4xf32>, vector<4x32xf32>, vector<8x32xf32> -> vector<8x32xf32>
    %220 = arith.addf %218, %219 : vector<8x32xf32>
    %221 = vector.broadcast %17 : vector<1x32xf32> to vector<8x32xf32>
    %222 = arith.addf %220, %221 : vector<8x32xf32>
    %cst_84 = arith.constant 0.000000e+00 : f32
    %223 = vector.broadcast %cst_84 : f32 to vector<8x32xf32>
    %224 = arith.maximumf %222, %223 : vector<8x32xf32>
    %cst_85 = arith.constant dense<0.000000e+00> : vector<8x16xf32>
    %225 = tpu.matmul %224, %18, %cst_85 {dimension_numbers = #tpu.dot_dimension_numbers<[1], [0], [0], [1], [0, 0, 1, 1], [], []>} : vector<8x32xf32>, vector<32x16xf32>, vector<8x16xf32> -> vector<8x16xf32>
    %226 = vector.broadcast %19 : vector<1x16xf32> to vector<8x16xf32>
    %227 = arith.addf %225, %226 : vector<8x16xf32>
    %c0_86 = arith.constant 0 : index
    %c0_87 = arith.constant 0 : index
    %228 = vector.load %arg23[%c0_86, %c0_87] : memref<8x16xf32, #tpu.memory_space<vmem>>, vector<8x16xf32>
    tpu.vector_store %arg23[%c0_86, %c0_87], %227 {strides = array<i32>} : memref<8x16xf32, #tpu.memory_space<vmem>>, vector<8x16xf32>,
    return
  }
}

</mosaic_0001>

<bundles_post_ra>
// kernel: basic_dnn_forward.1
= control target key start
LH: loop header
LB: loop body
LE: loop exit
PB: predicated region body
PF: predicated region fallthrough
CT: control target
= control target key end

     0   :  { %s2740_s0 = inlined_call_operand.vmem [shape: f32[6], index: 0, kind: input, shape index: {}]   ;;  %s2741_s1 = inlined_call_operand.vmem [shape: f32[8,16], index: 1, kind: input, shape index: {}]   ;;  %s2742_s2 = inlined_call_operand.vmem [shape: f32[8,8], index: 2, kind: input, shape index: {}]   ;;  %s2743_s3 = inlined_call_operand.vmem [shape: f32[16,32], index: 3, kind: input, shape index: {}]   ;;  %s2744_s4 = inlined_call_operand.vmem [shape: f32[1,32], index: 4, kind: input, shape index: {}]   ;;  %s2745_s5 = inlined_call_operand.vmem [shape: f32[32,4], index: 5, kind: input, shape index: {}]   ;;  %s2746_s6 = inlined_call_operand.vmem [shape: f32[32,4], index: 6, kind: input, shape index: {}]   ;;  %s2747_s7 = inlined_call_operand.vmem [shape: f32[1,4], index: 7, kind: input, shape index: {}]   ;;  %s2748_s8 = inlined_call_operand.vmem [shape: f32[1,4], index: 8, kind: input, shape index: {}]   ;;  %s2749_s9 = inlined_call_operand.vmem [shape: f32[4,8], index: 9, kind: input, shape index: {}]   ;;  %s2750_s10 = inlined_call_operand.vmem [shape: f32[4,8], index: 10, kind: input, shape index: {}]   ;;  %s2751_s11 = inlined_call_operand.vmem [shape: f32[1,8], index: 11, kind: input, shape index: {}]   ;;  %s2752_s12 = inlined_call_operand.vmem [shape: f32[8,8], index: 12, kind: input, shape index: {}]   ;;  %s2753_s13 = inlined_call_operand.vmem [shape: f32[1,8], index: 13, kind: input, shape index: {}]   ;;  %s2754_s14 = inlined_call_operand.vmem [shape: f32[8,3], index: 14, kind: input, shape index: {}]   ;;  %s2755_s15 = inlined_call_operand.vmem [shape: f32[8,3], index: 15, kind: input, shape index: {}]   ;;  %s2756_s16 = inlined_call_operand.vmem [shape: f32[1,3], index: 16, kind: input, shape index: {}]   ;;  %s2757_s17 = inlined_call_operand.vmem [shape: f32[1,3], index: 17, kind: input, shape index: {}]   ;;  %s2758_s18 = inlined_call_operand.vmem [shape: f32[4,32], index: 18, kind: input, shape index: {}]   ;;  %s2759_s19 = inlined_call_operand.vmem [shape: f32[4,32], index: 19, kind: input, shape index: {}]   ;;  %s2760_s20 = inlined_call_operand.vmem [shape: f32[1,32], index: 20, kind: input, shape index: {}]   ;;  %s2761_s21 = inlined_call_operand.vmem [shape: f32[32,16], index: 21, kind: input, shape index: {}]   ;;  %s2762_s22 = inlined_call_operand.vmem [shape: f32[1,16], index: 22, kind: input, shape index: {}]   ;;  %s2763_s23 = inlined_call_operand.hbm [shape: f32[8,16], index: 23, kind: output, shape index: {}]  }
   0x1   :  { %2767 = sst [smem:[#allocation8_spill]] %s2740_s0 }
   0x2   :  { %2768 = sst [smem:[#allocation9_spill]] %s2741_s1 }
   0x3   :  { %2769 = sst [smem:[#allocation10_spill]] %s2742_s2 }
   0x4   :  { %2770 = sst [smem:[#allocation11_spill]] %s2743_s3 }
   0x5   :  { %2771 = sst [smem:[#allocation12_spill]] %s2744_s4 }
   0x6   :  { %2772 = sst [smem:[#allocation13_spill]] %s2745_s5 }
   0x7   :  { %2773 = sst [smem:[#allocation14_spill]] %s2746_s6 }
   0x8   :  { %2774 = sst [smem:[#allocation15_spill]] %s2747_s7 }
   0x9   :  { %28 = vsyncpa [#allocation4], 0 }
   0xa   :  { %29 = vsyncpa [#allocation3], 0  ;;  %s2775_s24 = sld [smem:[#allocation8_spill]] }
  0x10   :  { %s36_s25 = sshll.u32 %s2775_s24, 4  ;;  %s37_s25 = int_to_ptr.vmem [resolvable:$true] %s36_s25 }
  0x11   :  { %s2309_s5 = scalar_lea.vmem %s37_s25, 16  ;;  %p2314_p1 = scmp.lt.s32.totalorder %s37_s25, %s37_s25 }
  0x12   :  { %p2310_p0 = scmp.ne.s32.totalorder %s37_s25, %s2309_s5  ;;  %p2315_p2 = scmp.lt.s32.totalorder %s2309_s5, %s2309_s5 }
  0x14   :  { %p2316_p3 = por %p2315_p2, %p2314_p1 }
  0x16   :  { %p2317_p4 = pnand %p2316_p3, %p2310_p0 }
  0x18   :  { %2320 = shalt.err (!%p2317_p4)
}
  0x19   :  { %s2347_s1 = smov [#allocation2]  }
  0x1a   :  { %39 = dma.vmem_to_smem %s37_s25, 16, %s2347_s1, [#allocation4]  }
  0x1b   :  { %2343 = dma.done.wait [#allocation4], 16  }
  0x1c   :  { %2344 = vsyncadd [#allocation4], 4294967280 }
  0x1d   :  { %87 = sfence }
  0x1e   :  { %s2776_s6 = sld [smem:[#allocation11_spill]]  ;;  %v2348_v2 = vmov 0.0|0.0   ;;  %vm2349_vm0 = vmmov 0   ;;  %v2350_v4 = vmov 0.0   ;;  %s2777_s3 = sld [smem:[#allocation13_spill]]  ;;  %vm125_vm1 = vcmask 130048  }
  0x1f   :  { %2258 = vmatprep.subr.bf16.mxu1 %v2348_v2  ;;  %2127 = vmatprep.mubr.msk.f32.mxu1 %vm2349_vm0, %v2350_v4  ;;  %s2778_s25 = sld [smem:[#allocation14_spill]]  ;;  %s2780_s26 = sld [smem:[#allocation12_spill]]  ;;  %vm206_vm2 = vcmask 261120   ;;  %v2013_v24 = vld [vmem:[%s2748_s8] ss:$0 sm:$0xff]  ;;  %vm359_vm3 = vcmask 31744   ;;  %v367_v35 = vlaneseq }
  0x20   :  { %2267 = vmatprep.subr.bf16.mxu0 %v2348_v2  ;;  %2149 = vmatprep.mubr.msk.f32.mxu0 %vm2349_vm0, %v2350_v4  ;;  %s2781_s2 = sld [smem:[#allocation15_spill]]  ;;  %s2017_s7 = sld [smem:[#allocation2 + $0x1]]  ;;  %vm405_vm7 = vcmask 1043456   ;;  %v2351_v62 = vmov 1.0   ;;  %vm479_vm10 = vcmask 64512  }
  0x21   :  { %s382_s28 = sld [smem:[#allocation2]]  ;;  %s2019_s29 = sld [smem:[#allocation2 + $0x3]]  ;;  %v368_v36 = vshrl.u32 %v367_v35, 7  ;;  %v370_v37 = vand.u32 127, %v367_v35  ;;  %v101_v35 = vld [vmem:[%s2749_s9] sm:$0xf] }
  0x22   :  { %s2018_s0 = sld [smem:[#allocation2 + $0x2]]  ;;  %s2021_s8 = sld [smem:[#allocation2 + $0x5]] }
  0x23   :  { %s2020_s4 = sld [smem:[#allocation2 + $0x4]]  ;;  %v2542_v38 = vsub.s32 %v370_v37, %v368_v36  ;;  %v371_v51 = vmul.u32 2, %v370_v37  ;;  %s2784_s5 = sld [smem:[#allocation10_spill]] }
  0x24   :  { %v88_v0 = vld [vmem:[%s2776_s6] sm:$0xff]  ;;  %v89_v1 = vld [vmem:[%s2776_s6 + $0x8] sm:$0xff]  ;;  %s2779_s6 = sld [smem:[#allocation9_spill]]  ;;  %v93_v12 = vld [vmem:[%s2777_s3 + $0x10] sm:$0xff] }
  0x25   :  { %v2259_v3 = vpack.c.bf16 %v89_v1, %v88_v0  ;;  %v91_v5 = vld [vmem:[%s2777_s3] sm:$0xff]  ;;  %v92_v6 = vld [vmem:[%s2777_s3 + $0x8] sm:$0xff]  ;;  %v94_v13 = vld [vmem:[%s2777_s3 + $0x18] sm:$0xff]  ;;  %vm381_vm4 = vcmp.eq.s32.totalorder %v2542_v38, 0  ;;  %vm388_vm5 = vcmp.eq.s32.totalorder %v2542_v38, 1  ;;  %vm395_vm6 = vcmp.eq.s32.totalorder %v2542_v38, 2 }
  0x26   :  { %v95_v7 = vld [vmem:[%s2778_s25] sm:$0xff]  ;;  %v96_v8 = vld [vmem:[%s2778_s25 + $0x8] sm:$0xff]  ;;  %v2262_v10 = vpack.c.bf16 %v92_v6, %v91_v5  ;;  %v97_v14 = vld [vmem:[%s2778_s25 + $0x10] sm:$0xff]  ;;  %v2265_v15 = vpack.c.bf16 %v94_v13, %v93_v12  ;;  %v386_v39 = vstv %s2017_s7  ;;  %v375_v52 = vadd.s32 1, %v371_v51 }
  0x27   :  { %2260 = vmatpush3.bf16.msra.mxu1 %v2259_v3  ;;  %v2268_v11 = vpack.c.bf16 %v96_v8, %v95_v7  ;;  %v98_v16 = vld [vmem:[%s2778_s25 + $0x18] sm:$0xff]  ;;  %v2009_v18 = vld [vmem:[%s2780_s26] ss:$0 sm:$0xff]  ;;  %v383_v40 = vstv %s382_s28  ;;  %v387_v41 = vsel %vm381_vm4, %v386_v39, 0.0  ;;  %v393_v42 = vstv %s2019_s29 }
  0x28   :  { %2261 = vmatprep.subr.bf16.mxu1 %v2348_v2  ;;  %v2271_v17 = vpack.c.bf16 %v98_v16, %v97_v14  ;;  %v2011_v23 = vld [vmem:[%s2781_s2] ss:$0 sm:$0xff]  ;;  %v384_v43 = vsel %vm381_vm4, %v383_v40, 0.0  ;;  %v394_v44 = vsel %vm388_vm5, %v393_v42, %v387_v41  ;;  %v400_v45 = vstv %s2021_s8 }
  0x29   :  { %2269 = vmatpush3.bf16.msra.mxu0 %v2268_v11  ;;  %v390_v46 = vstv %s2018_s0  ;;  %v401_v47 = vsel %vm395_vm6, %v400_v45, %v394_v44  ;;  %v397_v49 = vstv %s2020_s4  ;;  %vm2563_vm8 = vcmp.eq.s32.totalorder %v368_v36, %v371_v51  ;;  %v379_v0 = vld [vmem:[%s2784_s5] sm:$0xff] }
  0x2a   :  { %v118_v9 = vld [vmem:[%s2779_s6] sm:$0xff]  ;;  %2270 = vmatprep.subr.bf16.mxu0 %v2348_v2  ;;  %v391_v48 = vsel %vm388_vm5, %v390_v46, %v384_v43  ;;  %vm376_vm9 = vcmp.eq.s32.totalorder %v368_v36, %v375_v52  ;;  %v2352_v38 = vmov 0  }
  0x2b   :  { %2128 = vmatmul.mubr.msk.f32.vlgmr.msra.gmra.mrb[0].mxu1 %vm125_vm1, %v118_v9  ;;  %v398_v50 = vsel %vm395_vm6, %v397_v49, %v391_v48  ;;  %v104_v39 = vld [vmem:[%s2752_s12] sm:$0xff]  ;;  %2295 = vset.pattern.permute.xlu1 %v2352_v38 }
  0x2c   :  { %2263 = vmatpush3.bf16.msra.mxu1 %v2262_v10  ;;  %2138 = vmatprep.mubr.msk.f32.mxu1 %vm2349_vm0, %v2350_v4  ;;  %v2038_v42 = vld [vmem:[%s2751_s11] ss:$0 sm:$0xff] }
  0x2d   :  { %2264 = vmatprep.subr.bf16.mxu1 %v2348_v2  ;;  %2272 = vmatpush3.bf16.msra.mxu0 %v2271_v17  ;;  %v107_v48 = vld [vmem:[%s2755_s15] sm:$0xff] }
  0x2e   :  { %2162 = vmatprep.subr.mxu0 %v2350_v4  ;;  %v106_v49 = vld [vmem:[%s2754_s14] sm:$0xff]  ;;  %2294 = vset.pattern.permute.xlu0 %v2352_v38 }
  0x30   :  { %2266 = vmatpush3.bf16.msra.mxu1 %v2265_v15 }
  0x31   :  { %2152 = vmatprep.subr.mxu1 %v2350_v4 }
  0xfe   :  { %v195_v19 = vpop.f32.mrb[0].mxu1 }
  0xff   :  { %v196_v20 = vadd.f32 %v2009_v18, %v195_v19  ;;  %v2129_v21 = vpop.f32.mrb[1].mxu1  ;;  %v102_v18 = vld [vmem:[%s2750_s10] sm:$0xf] }
 0x101   :  { %v199_v22 = vmax.f32 %v196_v20, 0.0 }
 0x103   :  { %2139 = vmatmul.mubr.msk.f32.vlgmr.msra.gmra.mrb[2].mxu1 %vm206_vm2, %v199_v22  ;;  %2150 = vmatmul.mubr.msk.f32.vlgmr.msra.gmra.mrb[0].mxu0 %vm206_vm2, %v199_v22 }
 0x104   :  { %2154 = vmatprep.mubr.msk.f32.mxu1 %vm2349_vm0, %v2350_v4  ;;  %2164 = vmatprep.mubr.msk.f32.mxu0 %vm2349_vm0, %v2350_v4 }
 0x105   :  { %2163 = vmatpush3.msk.msra.mxu0 %vm405_vm7, %v401_v47  ;;  %2153 = vmatpush3.msk.msra.mxu1 %vm405_vm7, %v398_v50 }
 0x106   :  { %2167 = vmatprep.subr.mxu0 %v2350_v4  ;;  %2157 = vmatprep.subr.mxu1 %v2350_v4 }
 0x1d6   :  { %v276_v25 = vpop.f32.mrb[2].mxu1  ;;  %v352_v26 = vpop.f32.mrb[0].mxu0 }
 0x1d7   :  { %v277_v27 = vadd.f32 %v2011_v23, %v276_v25  ;;  %v353_v28 = vadd.f32 %v2013_v24, %v352_v26  ;;  %v2140_v29 = vpop.f32.mrb[3].mxu1  ;;  %v2151_v30 = vpop.f32.mrb[1].mxu0 }
 0x1d9   :  { %v356_v31 = vmul.f32 %v277_v27, %v277_v27  ;;  %v357_v32 = vmul.f32 %v353_v28, %v353_v28 }
 0x1db   :  { %v358_v33 = vadd.f32 %v357_v32, %v356_v31 }
 0x1dd   :  { %v360_v34 = vsel %vm359_vm3, %v358_v33, 0.0 }
 0x1de   :  { %361 = vadd.xlane.f32.xlu0 %v360_v34 }
 0x26b   :  { %v362_v54 = vpop.xlane.xlu0 %361 }
 0x26c   :  { %2299 = vrsqrt.f32 %v362_v54  ;;  %v2045_v54 = vsel %vm381_vm4, 1.0, %v2350_v4 }
 0x276   :  { %v2300_v55 = vpop.eup %2299 }
 0x277   :  { %v364_v56 = vmul.f32 2.0, %v2300_v55 }
 0x279   :  { %v365_v57 = vmul.f32 %v364_v56, %v277_v27  ;;  %v366_v58 = vmul.f32 %v364_v56, %v353_v28  ;;  %v2050_v56 = vsel %vm388_vm5, 1.0, %v2350_v4 }
 0x27b   :  { %2155 = vmatmul.mubr.msk.f32.vlgmr.msra.gmra.mrb[4].mxu1 %vm359_vm3, %v365_v57  ;;  %2165 = vmatmul.mubr.msk.f32.vlgmr.msra.gmra.mrb[2].mxu0 %vm359_vm3, %v366_v58  ;;  %v853_v59 = vmul.f32 %v365_v57, %v365_v57  ;;  %v854_v60 = vmul.f32 %v366_v58, %v366_v58 }
 0x27c   :  { %2168 = vmatpush3.msk.msra.mxu0 %vm405_vm7, %v401_v47  ;;  %2169 = vmatprep.mubr.msk.f32.mxu0 %vm2349_vm0, %v2350_v4 }
 0x27d   :  { %2172 = vmatprep.subr.mxu0 %v2350_v4  ;;  %v855_v61 = vadd.f32 %v854_v60, %v853_v59  ;;  %2158 = vmatpush3.msk.msra.mxu1 %vm2563_vm8, %v2351_v62  ;;  %v2043_v59 = vld [vmem:[%s2757_s17] ss:$0 sm:$0xff] }
 0x27e   :  { %2159 = vmatprep.mubr.msk.f32.mxu1 %vm2349_vm0, %v2350_v4  ;;  %2182 = vmatprep.subr.mxu1 %v2350_v4 }
 0x27f   :  { %2170 = vmatmul.mubr.msk.f32.vlgmr.msra.gmra.mrb[4].mxu0 %vm359_vm3, %v365_v57  ;;  %v856_v63 = vsel %vm359_vm3, %v855_v61, 0.0 }
 0x280   :  { %2173 = vmatpush3.msk.msra.mxu0 %vm376_vm9, %v2351_v62  ;;  %857 = vadd.xlane.f32.xlu0 %v856_v63 }
 0x281   :  { %2174 = vmatprep.mubr.msk.f32.mxu0 %vm2349_vm0, %v2350_v4  ;;  %2177 = vmatprep.subr.mxu0 %v2350_v4 }
 0x283   :  { %2160 = vmatmul.mubr.msk.f32.vlgmr.msra.gmra.mrb[4].mxu1 %vm479_vm10, %v379_v0 }
 0x284   :  { %2184 = vmatprep.mubr.msk.f32.mxu1 %vm2349_vm0, %v2350_v4  ;;  %2183 = vmatpush3.msk.msra.mxu1 %vm405_vm7, %v102_v18  ;;  %v111_v18 = vld [vmem:[%s2759_s19] sm:$0xf] }
 0x285   :  { %2187 = vmatprep.subr.mxu1 %v2350_v4 }
 0x287   :  { %2175 = vmatmul.mubr.msk.f32.vlgmr.msra.gmra.mrb[4].mxu0 %vm479_vm10, %v379_v0 }
 0x288   :  { %2178 = vmatpush3.msk.msra.mxu0 %vm405_vm7, %v398_v50  ;;  %2179 = vmatprep.mubr.msk.f32.mxu0 %vm2349_vm0, %v2350_v4  ;;  %v2039_v50 = vld [vmem:[%s2753_s13] ss:$0 sm:$0xff] }
 0x289   :  { %2197 = vmatprep.subr.mxu0 %v2350_v4 }
 0x28f   :  { %2180 = vmatmul.mubr.msk.f32.vlgmr.msra.gmra.mrb[4].mxu0 %vm359_vm3, %v366_v58 }
 0x290   :  { %2199 = vmatprep.mubr.msk.f32.mxu0 %vm2349_vm0, %v2350_v4  ;;  %2198 = vmatpush3.msra.mxu0 %v106_v49  ;;  %v113_v49 = vld [vmem:[%s2761_s21] sm:$0xff] }
 0x291   :  { %2207 = vmatprep.subr.mxu0 %v2350_v4 }
 0x30d   :  { %v858_v19 = vpop.xlane.xlu0 %857 }
 0x30e   :  { %2301 = vrcp.f32 %v858_v19  ;;  %v110_v19 = vld [vmem:[%s2758_s18] sm:$0xf] }
 0x318   :  { %v2302_v21 = vpop.eup %2301 }
 0x34e   :  { %v625_v1 = vpop.f32.mrb[2].mxu0 }
 0x34f   :  { %v2166_v3 = vpop.f32.mrb[3].mxu0 }
 0x356   :  { %v549_v5 = vpop.f32.mrb[4].mxu1 }
 0x357   :  { %v629_v6 = vsub.f32 %v549_v5, %v625_v1  ;;  %v2161_v7 = vpop.f32.mrb[5].mxu1 }
 0x359   :  { %v841_v10 = vmul.f32 %v629_v6, %v365_v57  ;;  %v848_v14 = vmul.f32 %v629_v6, %v366_v58 }
 0x362   :  { %v836_v8 = vpop.f32.mrb[4].mxu0 }
 0x363   :  { %v2181_v9 = vpop.f32.mrb[5].mxu0  ;;  %v842_v11 = vmul.f32 %v836_v8, %v366_v58  ;;  %v847_v12 = vmul.f32 %v836_v8, %v365_v57  ;;  %v2055_v57 = vsel %vm395_vm6, 1.0, %v2350_v4  ;;  %v2041_v58 = vld [vmem:[%s2756_s16] ss:$0 sm:$0xff] }
 0x364   :  { %v2354_v9 = vmov 2  }
 0x365   :  { %v843_v13 = vadd.f32 %v842_v11, %v841_v10  ;;  %v849_v16 = vsub.f32 %v847_v12, %v848_v14 }
 0x367   :  { %v844_v15 = vsel %vm359_vm3, %v843_v13, 0.0  ;;  %v850_v17 = vsel %vm359_vm3, %v849_v16, 0.0 }
 0x368   :  { %845 = vadd.xlane.f32.xlu1 %v844_v15 }
 0x36c   :  { %851 = vadd.xlane.f32.xlu1 %v850_v17 }
 0x3f5   :  { %v846_v20 = vpop.xlane.xlu1 %845 }
 0x3f6   :  { %v860_v22 = vmul.f32 %v2302_v21, %v846_v20 }
 0x3f8   :  { %v862_v25 = vmul.f32 %v860_v22, %v860_v22  ;;  %v870_v29 = vmul.f32 %v860_v22, %v836_v8  ;;  %v866_v33 = vmul.f32 %v860_v22, %v629_v6 }
 0x3f9   :  { %v852_v23 = vpop.xlane.xlu1 %851 }
 0x3fa   :  { %v861_v24 = vmul.f32 %v2302_v21, %v852_v23 }
 0x3fc   :  { %v863_v26 = vmul.f32 %v861_v24, %v861_v24  ;;  %v871_v28 = vmul.f32 %v861_v24, %v629_v6  ;;  %v867_v30 = vmul.f32 %v861_v24, %v836_v8  ;;  %v2353_v8 = vmov 1  }
 0x3fe   :  { %v864_v27 = vadd.f32 %v863_v26, %v862_v25  ;;  %v872_v31 = vsub.f32 %v870_v29, %v871_v28  ;;  %v868_v36 = vadd.f32 %v867_v30, %v866_v33 }
 0x400   :  { %2303 = vrcp.f32 %v864_v27 }
 0x40a   :  { %v2304_v32 = vpop.eup %2303 }
 0x40b   :  { %v2605_v34 = vmul.f32 %v2304_v32, %v872_v31  ;;  %v869_v37 = vmul.f32 %v2304_v32, %v868_v36 }
 0x40d   :  { %2185 = vmatmul.mubr.msk.f32.vlgmr.msra.gmra.mrb[6].mxu1 %vm359_vm3, %v2605_v34 }
 0x40e   :  { %2188 = vmatpush3.msk.msra.mxu1 %vm405_vm7, %v101_v35  ;;  %2189 = vmatprep.mubr.msk.f32.mxu1 %vm2349_vm0, %v2350_v4 }
 0x40f   :  { %2192 = vmatprep.subr.mxu1 %v2350_v4 }
 0x411   :  { %2190 = vmatmul.mubr.msk.f32.vlgmr.msra.gmra.mrb[8].mxu1 %vm359_vm3, %v869_v37 }
 0x412   :  { %2194 = vmatprep.mubr.msk.f32.mxu1 %vm2349_vm0, %v2350_v4  ;;  %2193 = vmatpush3.msra.mxu1 %v104_v39 }
 0x413   :  { %2202 = vmatprep.subr.mxu1 %v2350_v4 }
 0x4e0   :  { %v946_v40 = vpop.f32.mrb[6].mxu1 }
 0x4e1   :  { %v2186_v41 = vpop.f32.mrb[7].mxu1 }
 0x4e4   :  { %v1022_v43 = vpop.f32.mrb[8].mxu1 }
 0x4e5   :  { %v1023_v44 = vadd.f32 %v1022_v43, %v946_v40  ;;  %v2191_v45 = vpop.f32.mrb[9].mxu1 }
 0x4e7   :  { %v1032_v46 = vadd.f32 %v2038_v42, %v1023_v44 }
 0x4e9   :  { %2305 = vtanh.f32 %v1032_v46 }
 0x4f3   :  { %v2306_v47 = vpop.eup %2305 }
 0x4f4   :  { %2195 = vmatmul.mubr.msk.f32.vlgmr.msra.gmra.mrb[10].mxu1 %vm479_vm10, %v2306_v47 }
 0x4f5   :  { %2204 = vmatprep.mubr.msk.f32.mxu1 %vm2349_vm0, %v2350_v4  ;;  %2203 = vmatpush3.msra.mxu1 %v107_v48 }
 0x4f6   :  { %2212 = vmatprep.subr.mxu1 %v2350_v4 }
 0x5c7   :  { %v1109_v51 = vpop.f32.mrb[10].mxu1 }
 0x5c8   :  { %v1110_v52 = vadd.f32 %v2039_v50, %v1109_v51  ;;  %v2196_v53 = vpop.f32.mrb[11].mxu1  ;;  %v114_v50 = vld [vmem:[%s2761_s21 + $0x8] sm:$0xff] }
 0x5c9   :  { %v2274_v51 = vpack.c.bf16 %v114_v50, %v113_v49 }
 0x5ca   :  { %2307 = vtanh.f32 %v1110_v52  ;;  %v115_v52 = vld [vmem:[%s2761_s21 + $0x10] sm:$0xff] }
 0x5d4   :  { %v2308_v55 = vpop.eup %2307 }
 0x5d5   :  { %2200 = vmatmul.mubr.msk.f32.vlgmr.msra.gmra.mrb[6].mxu0 %vm479_vm10, %v2308_v55  ;;  %2205 = vmatmul.mubr.msk.f32.vlgmr.msra.gmra.mrb[12].mxu1 %vm479_vm10, %v2308_v55  ;;  %v2064_v55 = vld [vmem:[%s2760_s20] ss:$0 sm:$0xff] }
 0x5d6   :  { %2208 = vmatpush3.msk.msra.mxu0 %vm405_vm7, %v2045_v54  ;;  %2209 = vmatprep.mubr.msk.f32.mxu0 %vm2349_vm0, %v2350_v4 }
 0x5d7   :  { %2213 = vmatpush3.msk.msra.mxu1 %vm405_vm7, %v2045_v54  ;;  %2214 = vmatprep.mubr.msk.f32.mxu1 %vm2349_vm0, %v2350_v4 }
 0x5d8   :  { %2217 = vmatprep.subr.mxu0 %v2350_v4  ;;  %2222 = vmatprep.subr.mxu1 %v2350_v4 }
 0x5d9   :  { %2210 = vmatmul.mubr.msk.f32.vlgmr.msra.gmra.mrb[8].mxu0 %vm359_vm3, %v869_v37  ;;  %2215 = vmatmul.mubr.msk.f32.vlgmr.msra.gmra.mrb[14].mxu1 %vm359_vm3, %v2605_v34 }
 0x5da   :  { %2218 = vmatpush3.msk.msra.mxu0 %vm405_vm7, %v2050_v56  ;;  %2219 = vmatprep.mubr.msk.f32.mxu0 %vm2349_vm0, %v2350_v4 }
 0x5db   :  { %2223 = vmatpush3.msk.msra.mxu1 %vm405_vm7, %v2050_v56  ;;  %2224 = vmatprep.mubr.msk.f32.mxu1 %vm2349_vm0, %v2350_v4 }
 0x5dc   :  { %2227 = vmatprep.subr.mxu0 %v2350_v4  ;;  %2232 = vmatprep.subr.mxu1 %v2350_v4 }
 0x5dd   :  { %2220 = vmatmul.mubr.msk.f32.vlgmr.msra.gmra.mrb[10].mxu0 %vm359_vm3, %v869_v37  ;;  %2225 = vmatmul.mubr.msk.f32.vlgmr.msra.gmra.mrb[16].mxu1 %vm359_vm3, %v2605_v34 }
 0x5de   :  { %2228 = vmatpush3.msk.msra.mxu0 %vm405_vm7, %v2055_v57  ;;  %2229 = vmatprep.mubr.msk.f32.mxu0 %vm2349_vm0, %v2350_v4 }
 0x5df   :  { %2233 = vmatpush3.msk.msra.mxu1 %vm405_vm7, %v2055_v57  ;;  %2234 = vmatprep.mubr.msk.f32.mxu1 %vm2349_vm0, %v2350_v4 }
 0x5e0   :  { %2237 = vmatprep.subr.mxu0 %v2350_v4  ;;  %2242 = vmatprep.subr.mxu1 %v2350_v4 }
 0x5e1   :  { %2230 = vmatmul.mubr.msk.f32.vlgmr.msra.gmra.mrb[12].mxu0 %vm359_vm3, %v869_v37  ;;  %2235 = vmatmul.mubr.msk.f32.vlgmr.msra.gmra.mrb[18].mxu1 %vm359_vm3, %v2605_v34 }
 0x5e2   :  { %2239 = vmatprep.mubr.msk.f32.mxu0 %vm2349_vm0, %v2350_v4  ;;  %2244 = vmatprep.mubr.msk.f32.mxu1 %vm2349_vm0, %v2350_v4 }
 0x5e3   :  { %2238 = vmatpush3.msk.msra.mxu0 %vm405_vm7, %v111_v18  ;;  %2243 = vmatpush3.msk.msra.mxu1 %vm405_vm7, %v110_v19 }
 0x5e4   :  { %2273 = vmatprep.subr.bf16.mxu0 %v2348_v2 }
 0x6a8   :  { %v1189_v60 = vpop.f32.mrb[6].mxu0  ;;  %v1265_v61 = vpop.f32.mrb[12].mxu1 }
 0x6a9   :  { %v1190_v62 = vadd.f32 %v2041_v58, %v1189_v60  ;;  %v1266_v63 = vadd.f32 %v2043_v59, %v1265_v61  ;;  %v2201_v0 = vpop.f32.mrb[7].mxu0  ;;  %v2206_v1 = vpop.f32.mrb[13].mxu1  ;;  %v2065_v60 = vld [vmem:[%s2762_s22] ss:$0 sm:$0xff] }
 0x6ab   :  { %1416 = vperm.xlu0 %2294, %v1190_v62   ;;  %1423 = vperm.xlu1 %2295, %v1266_v63  }
 0x6ac   :  { %v1340_v3 = vpop.f32.mrb[8].mxu0  ;;  %v1410_v5 = vpop.f32.mrb[14].mxu1 }
 0x6ad   :  { %v2211_v6 = vpop.f32.mrb[9].mxu0  ;;  %v2216_v7 = vpop.f32.mrb[15].mxu1 }
 0x6af   :  { %2296 = vset.pattern.permute.xlu1 %v2353_v8  ;;  %2298 = vset.pattern.permute.xlu0 %v2354_v9 }
 0x6b0   :  { %v1503_v10 = vpop.f32.mrb[10].mxu0  ;;  %1578 = vperm.xlu1 %2296, %v1190_v62   ;;  %v1573_v11 = vpop.f32.mrb[16].mxu1 }
 0x6b1   :  { %v2221_v12 = vpop.f32.mrb[11].mxu0  ;;  %v2226_v13 = vpop.f32.mrb[17].mxu1 }
 0x6b4   :  { %v1664_v14 = vpop.f32.mrb[12].mxu0  ;;  %1584 = vperm.xlu1 %2296, %v1266_v63   ;;  %v1734_v15 = vpop.f32.mrb[18].mxu1 }
 0x6b5   :  { %v2231_v16 = vpop.f32.mrb[13].mxu0  ;;  %v2236_v17 = vpop.f32.mrb[19].mxu1 }
 0x6b8   :  { %2297 = vset.pattern.permute.xlu1 %v2354_v9 }
 0x6b9   :  { %1739 = vperm.xlu1 %2297, %v1190_v62  }
 0x6bd   :  { %1745 = vperm.xlu1 %2297, %v1266_v63  }
 0x72a   :  { %v1417_v20 = vpop.permute.xlu0 %1416  ;;  %v1424_v21 = vpop.permute.xlu1 %1423 }
 0x72b   :  { %v1419_v22 = vmul.f32 %v1417_v20, %v1340_v3  ;;  %v1428_v23 = vmul.f32 %v1417_v20, %v1410_v5  ;;  %v1426_v24 = vmul.f32 %v1424_v21, %v1410_v5  ;;  %v1430_v25 = vmul.f32 %v1424_v21, %v1340_v3 }
 0x72d   :  { %v1427_v26 = vsub.f32 %v1419_v22, %v1426_v24  ;;  %v1431_v27 = vadd.f32 %v1430_v25, %v1428_v23 }
 0x72f   :  { %v1579_v28 = vpop.permute.xlu1 %1578 }
 0x730   :  { %v1581_v29 = vmul.f32 %v1579_v28, %v1503_v10  ;;  %v1589_v30 = vmul.f32 %v1579_v28, %v1573_v11 }
 0x732   :  { %v1582_v31 = vadd.f32 %v1581_v29, %v1427_v26  ;;  %v1590_v32 = vadd.f32 %v1589_v30, %v1431_v27 }
 0x733   :  { %v1585_v33 = vpop.permute.xlu1 %1584 }
 0x734   :  { %v1587_v34 = vmul.f32 %v1585_v33, %v1573_v11  ;;  %v1591_v35 = vmul.f32 %v1585_v33, %v1503_v10 }
 0x736   :  { %v1588_v36 = vsub.f32 %v1582_v31, %v1587_v34  ;;  %v1592_v37 = vadd.f32 %v1591_v35, %v1590_v32 }
 0x738   :  { %v1740_v39 = vpop.permute.xlu1 %1739 }
 0x739   :  { %v1742_v40 = vmul.f32 %v1740_v39, %v1664_v14  ;;  %v1750_v41 = vmul.f32 %v1740_v39, %v1734_v15 }
 0x73b   :  { %v1743_v42 = vadd.f32 %v1742_v40, %v1588_v36  ;;  %v1751_v43 = vadd.f32 %v1750_v41, %v1592_v37 }
 0x73c   :  { %v1746_v44 = vpop.permute.xlu1 %1745 }
 0x73d   :  { %v1748_v45 = vmul.f32 %v1746_v44, %v1734_v15  ;;  %v1752_v46 = vmul.f32 %v1746_v44, %v1664_v14 }
 0x73f   :  { %v1749_v47 = vsub.f32 %v1743_v42, %v1748_v45  ;;  %v1753_v48 = vadd.f32 %v1752_v46, %v1751_v43 }
 0x741   :  { %2240 = vmatmul.mubr.msk.f32.vlgmr.msra.gmra.mrb[14].mxu0 %vm359_vm3, %v1753_v48  ;;  %2245 = vmatmul.mubr.msk.f32.vlgmr.msra.gmra.mrb[20].mxu1 %vm359_vm3, %v1749_v47 }
 0x742   :  { %2255 = vmatprep.mubr.msk.f32.mxu0 %vm2349_vm0, %v2350_v4  ;;  %2275 = vmatpush3.bf16.msra.mxu0 %v2274_v51  ;;  %v116_v4 = vld [vmem:[%s2761_s21 + $0x18] sm:$0xff]  ;;  %s2355_s21 = smov [#allocation5]  }
 0x743   :  { %2276 = vmatprep.subr.bf16.mxu0 %v2348_v2  ;;  %v2277_v53 = vpack.c.bf16 %v116_v4, %v115_v52  ;;  %s2000_s6 = sshll.u32 %s2355_s21, 4  ;;  %s2001_s6 = int_to_ptr.vmem [resolvable:$true] %s2000_s6 }
 0x744   :  { %s2321_s20 = scalar_lea.vmem %s2001_s6, 128  ;;  %p2326_p6 = scmp.lt.s32.totalorder %s2001_s6, %s2001_s6 }
 0x745   :  { %p2322_p5 = scmp.ne.s32.totalorder %s2001_s6, %s2321_s20  ;;  %p2327_p7 = scmp.lt.s32.totalorder %s2321_s20, %s2321_s20 }
 0x746   :  { %2278 = vmatpush3.bf16.msra.mxu0 %v2277_v53 }
 0x747   :  { %p2328_p8 = por %p2327_p7, %p2326_p6 }
 0x749   :  { %p2329_p9 = pnand %p2328_p8, %p2322_p5 }
 0x814   :  { %v1826_v54 = vpop.f32.mrb[14].mxu0  ;;  %v1902_v56 = vpop.f32.mrb[20].mxu1 }
 0x815   :  { %v1903_v57 = vadd.f32 %v1902_v56, %v1826_v54  ;;  %v2241_v38 = vpop.f32.mrb[15].mxu0  ;;  %v2246_v58 = vpop.f32.mrb[21].mxu1 }
 0x817   :  { %v1912_v2 = vadd.f32 %v2064_v55, %v1903_v57 }
 0x819   :  { %v1913_v59 = vmax.f32 %v1912_v2, 0.0 }
 0x81b   :  { %2256 = vmatmul.mubr.msk.f32.vlgmr.msra.gmra.mrb[16].mxu0 %vm206_vm2, %v1913_v59 }
 0x8ee   :  { %v1989_v61 = vpop.f32.mrb[16].mxu0 }
 0x8ef   :  { %v1990_v62 = vadd.f32 %v2065_v60, %v1989_v61  ;;  %v2257_v63 = vpop.f32.mrb[17].mxu0 }
 0x8f1   :  { %1993 = vst.msk [vmem:[#allocation5] sm:$0xff] %vm125_vm1, %v1990_v62 }
 0x8f2   :  { %2332 = shalt.err (!%p2329_p9)
}
 0x8f3   :  { %s2333_s7 = scalar_lea.hbm %s2763_s23, 128 }
 0x8f4   :  { %p2334_p10 = scmp.ne.s32.totalorder %s2763_s23, %s2333_s7  ;;  %p2337_p11 = scmp.lt.u32.totalorder %s2333_s7, %s2763_s23 }
 0x8f6   :  { %p2339_p12 = pnand %p2337_p11, %p2334_p10 }
 0x8f8   :  { %2342 = shalt.err (!%p2339_p12)
}
 0x8f9   :  { %2003 = dma.vmem_to_hbm [thread:$0]  %s2001_s6, 128, %s2763_s23, [#allocation3]  }
 0x8fa   :  { %2345 = dma.done.wait [#allocation3], 128  }
 0x8fb   :  { %2346 = vsyncadd [#allocation3], 4294967168 }
 0x8fc   :  { %2007 = vsyncpa [#allocation3], 1 }
 0x8fd   :  { %2008 = vsyncpa [#allocation4], 1 }

</bundles_post_ra>
